<compile_context>
chip_gen: v7x
topology: tpu7x:2x2x1
jax: 0.10.0
libtpu: 0.0.40
codegen_flags: <defaults>
</compile_context>

<pallas_src>
import functools

import jax
import jax.numpy as jnp
from jax.experimental import pallas as pl
from jax.experimental.pallas import tpu as pltpu

ALPHA = 0.5
BETA = 0.5
SMOOTH = 1e-5

_LANE = 128


def _combined_loss_kernel(logits_ref, targets_ref, ce_ref, inter_ref, denom_ref,
                          *, hw, tile, n_hw_inner, tail):
    # logits_ref : (1, C, T)     native dtype (f32/bf16) VMEM tile
    # targets_ref: (1, 1, T)     narrow int VMEM tile
    # ce_ref     : (1, 1, 1, 1)  f32 -- running CE sum for (batch, chunk)
    # inter_ref  : (1, 1, C, 1)  f32 -- running sum of probs * onehot per class
    # denom_ref  : (1, 1, C, 1)  f32 -- running sum of probs + onehot per class
    chunk = pl.program_id(1)
    j = pl.program_id(2)

    @pl.when(j == 0)
    def _init():
        ce_ref[...] = jnp.zeros_like(ce_ref)
        inter_ref[...] = jnp.zeros_like(inter_ref)
        denom_ref[...] = jnp.zeros_like(denom_ref)

    x = logits_ref[0].astype(jnp.float32)            # (C, T) upcast in-kernel
    tgt = targets_ref[0].astype(jnp.int32)           # (1, T)
    C, T = x.shape

    # ---- numerically-stable softmax / log-sum-exp over the class axis ----
    m = jnp.max(x, axis=0, keepdims=True)            # (1, T)
    e = jnp.exp(x - m)                                # (C, T)
    s = jnp.sum(e, axis=0, keepdims=True)             # (1, T)
    inv_s = pl.reciprocal(s, approx=False)            # exact (parity w/ reference)
    lse = m + jnp.log(s)                              # (1, T)
    probs = e * inv_s                                  # (C, T)

    # ---- one-hot as a bool mask (no f32 one-hot materialized) ----
    cls = jax.lax.broadcasted_iota(jnp.int32, (C, T), 0)
    onehot_mask = cls == tgt                           # (C, T) bool

    if tail:                                           # trace-time flag
        lane = jax.lax.broadcasted_iota(jnp.int32, (1, T), 1)
        rem = hw - (chunk * n_hw_inner + j) * tile     # valid lanes in this tile
        valid = lane < rem                             # (1, T) bool
        onehot_mask = jnp.logical_and(onehot_mask, valid)
        probs_for_sum = jnp.where(valid, probs, 0.0)
    else:
        probs_for_sum = probs

    # ---- cross-entropy partial sum: sum_pixels (lse - logit[target]) ----
    picked = jnp.sum(jnp.where(onehot_mask, x, 0.0), axis=0, keepdims=True)
    ce_pix = lse - picked                              # (1, T)
    if tail:
        ce_pix = jnp.where(valid, ce_pix, 0.0)
    ce_ref[...] += jnp.sum(ce_pix, axis=1, keepdims=True)[None, None]

    # ---- dice partial sums per class ----
    inter_t = jnp.sum(jnp.where(onehot_mask, probs, 0.0), axis=1, keepdims=True)
    count_t = jnp.sum(jnp.where(onehot_mask, 1.0, 0.0), axis=1, keepdims=True)
    denom_t = jnp.sum(probs_for_sum, axis=1, keepdims=True) + count_t
    inter_ref[...] += inter_t[None, None]              # (1, 1, C, 1)
    denom_ref[...] += denom_t[None, None]              # (1, 1, C, 1)


def _vmem_capacity_bytes():
    try:
        return int(pltpu.get_tpu_info().vmem_capacity_bytes)
    except Exception:
        return 64 * 1024 * 1024                        # conservative (v7x)


def _pick_hw_tile(hw, c, itemsize, vmem_bytes, max_logits_tile_bytes=4 << 20):
    """Lane tile size: big (multiple of 128) or full extent; never tiny."""
    # Bytes live in VMEM per HW lane: 2x double-buffered native logits tile,
    # ~6 f32 (C, T) temporaries, plus (double-buffered) narrow targets.
    per_lane = c * (2 * itemsize + 6 * 4) + 2
    cap_vmem = (vmem_bytes // 2) // per_lane
    cap_hbm = max_logits_tile_bytes // max(c * itemsize, 1)
    tile = min(cap_vmem, cap_hbm)
    tile = max(_LANE, (tile // _LANE) * _LANE)
    if tile >= hw:
        return hw                                      # single full-extent block
    return tile


def combined_loss(logits_nchw, targets_nhw, *, alpha=ALPHA, beta=BETA,
                  smooth=SMOOTH):
    """logits_nchw: (B, C, H, W) float (f32 or bf16), targets_nhw: (B, H, W) int."""
    B, C, H, W = logits_nchw.shape
    HW = H * W
    itemsize = jnp.dtype(logits_nchw.dtype).itemsize

    vmem_bytes = _vmem_capacity_bytes()
    tile = _pick_hw_tile(HW, C, itemsize, vmem_bytes)
    n_hw = -(-HW // tile)                              # cdiv
    tail = (HW % tile) != 0
    # 2-way split of the HW reduction so both TensorCores work even at B == 1.
    n_chunks = 2 if (n_hw >= 2 and n_hw % 2 == 0) else 1
    n_hw_inner = n_hw // n_chunks

    # Free reshapes only; logits keep their native dtype all the way to VMEM.
    logits = logits_nchw.reshape(B, C, HW)
    tgt_dtype = jnp.int8 if C <= 127 else jnp.int32
    targets = targets_nhw.reshape(B, 1, HW).astype(tgt_dtype)

    kernel = functools.partial(_combined_loss_kernel, hw=HW, tile=tile,
                               n_hw_inner=n_hw_inner, tail=tail)

    cost = pl.CostEstimate(
        flops=int(10 * B * C * HW),
        transcendentals=int(B * HW * (C + 2)),          # exp/class + log + recip
        bytes_accessed=int(B * C * HW * itemsize
                           + B * HW * jnp.dtype(tgt_dtype).itemsize
                           + B * n_chunks * (2 * C + 1) * 4),
    )
    vmem_limit = int(min(vmem_bytes * 3 // 4, 96 * 1024 * 1024))

    ce_sum, inter, denom = pl.pallas_call(
        kernel,
        grid=(B, n_chunks, n_hw_inner),
        in_specs=[
            pl.BlockSpec((1, C, tile),
                         lambda b, c, j: (b, 0, c * n_hw_inner + j)),
            pl.BlockSpec((1, 1, tile),
                         lambda b, c, j: (b, 0, c * n_hw_inner + j)),
        ],
        out_specs=(
            pl.BlockSpec((1, 1, 1, 1), lambda b, c, j: (b, c, 0, 0)),
            pl.BlockSpec((1, 1, C, 1), lambda b, c, j: (b, c, 0, 0)),
            pl.BlockSpec((1, 1, C, 1), lambda b, c, j: (b, c, 0, 0)),
        ),
        out_shape=(
            jax.ShapeDtypeStruct((B, n_chunks, 1, 1), jnp.float32),
            jax.ShapeDtypeStruct((B, n_chunks, C, 1), jnp.float32),
            jax.ShapeDtypeStruct((B, n_chunks, C, 1), jnp.float32),
        ),
        compiler_params=pltpu.CompilerParams(
            dimension_semantics=("parallel", "parallel", "arbitrary"),
            vmem_limit_bytes=vmem_limit,
        ),
        cost_estimate=cost,
    )(logits, targets)

    # ---- tiny final combine in plain JAX (matches the PyTorch reference) ----
    ce_loss = jnp.sum(ce_sum) / jnp.float32(B * HW)    # reduction='mean'
    inter_bc = jnp.sum(inter, axis=1)[..., 0]          # (B, C) sum over chunks
    denom_bc = jnp.sum(denom, axis=1)[..., 0]          # (B, C)
    dice = (2.0 * inter_bc + smooth) / (denom_bc + smooth)
    dice_loss = 1.0 - jnp.mean(dice)   # mean_c(1 - mean_b dice) == 1 - mean_{b,c}
    return alpha * ce_loss + beta * dice_loss


if __name__ == "__main__":
    key = jax.random.PRNGKey(0)
    k_logits, k_targets = jax.random.split(key)

    B, C, H, W = 2, 4, 16, 16
    logits = jax.random.normal(k_logits, (B, C, H, W), dtype=jnp.float32)
    targets = jax.random.randint(k_targets, (B, H, W), 0, C, dtype=jnp.int32)

    loss = jax.jit(combined_loss)(logits, targets)
    jax.block_until_ready(loss)
    print("KERNEL_OK")
</pallas_src>

<mosaic_0001>
module attributes {stable_mosaic.version = 11 : i64} {
  func.func @_combined_loss_kernel(%arg0: i32, %arg1: i32, %arg2: i32, %arg3: memref<1x4x256xf32, #tpu.memory_space<vmem>>, %arg4: memref<1x1x256xi8, #tpu.memory_space<vmem>>, %arg5: memref<1x1x1x1xf32, #tpu.memory_space<vmem>>, %arg6: memref<1x1x4x1xf32, #tpu.memory_space<vmem>>, %arg7: memref<1x1x4x1xf32, #tpu.memory_space<vmem>>) attributes {dimension_semantics = [#tpu.dimension_semantics<parallel>, #tpu.dimension_semantics<parallel>, #tpu.dimension_semantics<arbitrary>], iteration_bounds = array<i64: 2, 1, 1>, scalar_prefetch = 0 : i64, scratch_operands = 0 : i64, tpu.core_type = #tpu.core_type<tc>, window_params = [{transform_indices = @transform_0, window_bounds = array<i64: 1, 4, 256>}, {transform_indices = @transform_1, window_bounds = array<i64: 1, 1, 256>}, {transform_indices = @transform_2, window_bounds = array<i64: 1, 1, 1, 1>}, {transform_indices = @transform_3, window_bounds = array<i64: 1, 1, 4, 1>}, {transform_indices = @transform_4, window_bounds = array<i64: 1, 1, 4, 1>}]} {
    %c0_i32 = arith.constant 0 : i32
    %0 = arith.cmpi eq, %arg2, %c0_i32 : i32
    %1 = arith.extui %0 : i1 to i32
    %c0_i32_0 = arith.constant 0 : i32
    %2 = arith.cmpi ne, %1, %c0_i32_0 : i32
    scf.if %2 {
      %cst_40 = arith.constant 0.000000e+00 : f32
      %54 = vector.broadcast %cst_40 : f32 to vector<1x1x1x1xf32>
      %c0_41 = arith.constant 0 : index
      %c0_42 = arith.constant 0 : index
      %c0_43 = arith.constant 0 : index
      %c0_44 = arith.constant 0 : index
      %55 = vector.load %arg5[%c0_41, %c0_42, %c0_43, %c0_44] : memref<1x1x1x1xf32, #tpu.memory_space<vmem>>, vector<1x1x1x1xf32>
      tpu.vector_store %arg5[%c0_41, %c0_42, %c0_43, %c0_44], %54 {strides = array<i32>} : memref<1x1x1x1xf32, #tpu.memory_space<vmem>>, vector<1x1x1x1xf32>,
      %cst_45 = arith.constant 0.000000e+00 : f32
      %56 = vector.broadcast %cst_45 : f32 to vector<1x1x4x1xf32>
      %c0_46 = arith.constant 0 : index
      %c0_47 = arith.constant 0 : index
      %c0_48 = arith.constant 0 : index
      %c0_49 = arith.constant 0 : index
      %57 = vector.load %arg6[%c0_46, %c0_47, %c0_48, %c0_49] : memref<1x1x4x1xf32, #tpu.memory_space<vmem>>, vector<1x1x4x1xf32>
      tpu.vector_store %arg6[%c0_46, %c0_47, %c0_48, %c0_49], %56 {strides = array<i32>} : memref<1x1x4x1xf32, #tpu.memory_space<vmem>>, vector<1x1x4x1xf32>,
      %cst_50 = arith.constant 0.000000e+00 : f32
      %58 = vector.broadcast %cst_50 : f32 to vector<1x1x4x1xf32>
      %c0_51 = arith.constant 0 : index
      %c0_52 = arith.constant 0 : index
      %c0_53 = arith.constant 0 : index
      %c0_54 = arith.constant 0 : index
      %59 = vector.load %arg7[%c0_51, %c0_52, %c0_53, %c0_54] : memref<1x1x4x1xf32, #tpu.memory_space<vmem>>, vector<1x1x4x1xf32>
      tpu.vector_store %arg7[%c0_51, %c0_52, %c0_53, %c0_54], %58 {strides = array<i32>} : memref<1x1x4x1xf32, #tpu.memory_space<vmem>>, vector<1x1x4x1xf32>,
    } else {
    }
    %c0 = arith.constant 0 : index
    %c0_1 = arith.constant 0 : index
    %c0_2 = arith.constant 0 : index
    %3 = vector.load %arg3[%c0, %c0_1, %c0_2] : memref<1x4x256xf32, #tpu.memory_space<vmem>>, vector<1x4x256xf32>
    %4 = vector.shape_cast %3 : vector<1x4x256xf32> to vector<4x256xf32>
    %c0_3 = arith.constant 0 : index
    %c0_4 = arith.constant 0 : index
    %c0_5 = arith.constant 0 : index
    %5 = vector.load %arg4[%c0_3, %c0_4, %c0_5] : memref<1x1x256xi8, #tpu.memory_space<vmem>>, vector<1x1x256xi8>
    %6 = vector.shape_cast %5 : vector<1x1x256xi8> to vector<1x256xi8>
    %7 = arith.extsi %6 : vector<1x256xi8> to vector<1x256xi32>
    %cst = arith.constant dense<0xFF800000> : vector<256xf32>
    %8 = vector.multi_reduction <maximumf>, %4, %cst [0] : vector<4x256xf32> to vector<256xf32>
    %9 = vector.shape_cast %8 : vector<256xf32> to vector<1x256xf32>
    %10 = vector.broadcast %9 : vector<1x256xf32> to vector<4x256xf32>
    %11 = arith.subf %4, %10 : vector<4x256xf32>
    %12 = math.exp %11 : vector<4x256xf32>
    %cst_6 = arith.constant dense<0.000000e+00> : vector<256xf32>
    %13 = vector.multi_reduction <add>, %12, %cst_6 [0] : vector<4x256xf32> to vector<256xf32>
    %14 = vector.shape_cast %13 : vector<256xf32> to vector<1x256xf32>
    %15 = tpu.reciprocal %14 : vector<1x256xf32> -> vector<1x256xf32>
    %16 = math.log %14 : vector<1x256xf32>
    %17 = arith.addf %9, %16 : vector<1x256xf32>
    %18 = vector.broadcast %15 : vector<1x256xf32> to vector<4x256xf32>
    %19 = arith.mulf %12, %18 : vector<4x256xf32>
    %20 = tpu.iota {dimensions = array<i32: 0>} : vector<4x256xi32>
    %21 = vector.broadcast %7 : vector<1x256xi32> to vector<4x256xi32>
    %22 = arith.cmpi eq, %20, %21 : vector<4x256xi32>
    %cst_7 = arith.constant 0.000000e+00 : f32
    %23 = vector.broadcast %cst_7 : f32 to vector<4x256xf32>
    %24 = arith.select %22, %4, %23 : vector<4x256xi1>, vector<4x256xf32>
    %cst_8 = arith.constant dense<0.000000e+00> : vector<256xf32>
    %25 = vector.multi_reduction <add>, %24, %cst_8 [0] : vector<4x256xf32> to vector<256xf32>
    %26 = vector.shape_cast %25 : vector<256xf32> to vector<1x256xf32>
    %27 = arith.subf %17, %26 : vector<1x256xf32>
    %c0_9 = arith.constant 0 : index
    %c0_10 = arith.constant 0 : index
    %c0_11 = arith.constant 0 : index
    %c0_12 = arith.constant 0 : index
    %28 = vector.load %arg5[%c0_9, %c0_10, %c0_11, %c0_12] : memref<1x1x1x1xf32, #tpu.memory_space<vmem>>, vector<1x1x1x1xf32>
    %cst_13 = arith.constant dense<0.000000e+00> : vector<1xf32>
    %29 = vector.multi_reduction <add>, %27, %cst_13 [1] : vector<1x256xf32> to vector<1xf32>
    %30 = vector.shape_cast %29 : vector<1xf32> to vector<1x1xf32>
    %31 = vector.shape_cast %30 : vector<1x1xf32> to vector<1x1x1x1xf32>
    %32 = arith.addf %28, %31 : vector<1x1x1x1xf32>
    %c0_14 = arith.constant 0 : index
    %c0_15 = arith.constant 0 : index
    %c0_16 = arith.constant 0 : index
    %c0_17 = arith.constant 0 : index
    %33 = vector.load %arg5[%c0_14, %c0_15, %c0_16, %c0_17] : memref<1x1x1x1xf32, #tpu.memory_space<vmem>>, vector<1x1x1x1xf32>
    tpu.vector_store %arg5[%c0_14, %c0_15, %c0_16, %c0_17], %32 {strides = array<i32>} : memref<1x1x1x1xf32, #tpu.memory_space<vmem>>, vector<1x1x1x1xf32>,
    %cst_18 = arith.constant 0.000000e+00 : f32
    %34 = vector.broadcast %cst_18 : f32 to vector<4x256xf32>
    %35 = arith.select %22, %19, %34 : vector<4x256xi1>, vector<4x256xf32>
    %cst_19 = arith.constant dense<0.000000e+00> : vector<4xf32>
    %36 = vector.multi_reduction <add>, %35, %cst_19 [1] : vector<4x256xf32> to vector<4xf32>
    %37 = vector.shape_cast %36 : vector<4xf32> to vector<4x1xf32>
    %cst_20 = arith.constant 1.000000e+00 : f32
    %cst_21 = arith.constant 0.000000e+00 : f32
    %38 = vector.broadcast %cst_20 : f32 to vector<4x256xf32>
    %39 = vector.broadcast %cst_21 : f32 to vector<4x256xf32>
    %40 = arith.select %22, %38, %39 : vector<4x256xi1>, vector<4x256xf32>
    %cst_22 = arith.constant dense<0.000000e+00> : vector<4xf32>
    %41 = vector.multi_reduction <add>, %40, %cst_22 [1] : vector<4x256xf32> to vector<4xf32>
    %42 = vector.shape_cast %41 : vector<4xf32> to vector<4x1xf32>
    %cst_23 = arith.constant dense<0.000000e+00> : vector<4xf32>
    %43 = vector.multi_reduction <add>, %19, %cst_23 [1] : vector<4x256xf32> to vector<4xf32>
    %44 = vector.shape_cast %43 : vector<4xf32> to vector<4x1xf32>
    %45 = arith.addf %44, %42 : vector<4x1xf32>
    %c0_24 = arith.constant 0 : index
    %c0_25 = arith.constant 0 : index
    %c0_26 = arith.constant 0 : index
    %c0_27 = arith.constant 0 : index
    %46 = vector.load %arg6[%c0_24, %c0_25, %c0_26, %c0_27] : memref<1x1x4x1xf32, #tpu.memory_space<vmem>>, vector<1x1x4x1xf32>
    %47 = vector.shape_cast %37 : vector<4x1xf32> to vector<1x1x4x1xf32>
    %48 = arith.addf %46, %47 : vector<1x1x4x1xf32>
    %c0_28 = arith.constant 0 : index
    %c0_29 = arith.constant 0 : index
    %c0_30 = arith.constant 0 : index
    %c0_31 = arith.constant 0 : index
    %49 = vector.load %arg6[%c0_28, %c0_29, %c0_30, %c0_31] : memref<1x1x4x1xf32, #tpu.memory_space<vmem>>, vector<1x1x4x1xf32>
    tpu.vector_store %arg6[%c0_28, %c0_29, %c0_30, %c0_31], %48 {strides = array<i32>} : memref<1x1x4x1xf32, #tpu.memory_space<vmem>>, vector<1x1x4x1xf32>,
    %c0_32 = arith.constant 0 : index
    %c0_33 = arith.constant 0 : index
    %c0_34 = arith.constant 0 : index
    %c0_35 = arith.constant 0 : index
    %50 = vector.load %arg7[%c0_32, %c0_33, %c0_34, %c0_35] : memref<1x1x4x1xf32, #tpu.memory_space<vmem>>, vector<1x1x4x1xf32>
    %51 = vector.shape_cast %45 : vector<4x1xf32> to vector<1x1x4x1xf32>
    %52 = arith.addf %50, %51 : vector<1x1x4x1xf32>
    %c0_36 = arith.constant 0 : index
    %c0_37 = arith.constant 0 : index
    %c0_38 = arith.constant 0 : index
    %c0_39 = arith.constant 0 : index
    %53 = vector.load %arg7[%c0_36, %c0_37, %c0_38, %c0_39] : memref<1x1x4x1xf32, #tpu.memory_space<vmem>>, vector<1x1x4x1xf32>
    tpu.vector_store %arg7[%c0_36, %c0_37, %c0_38, %c0_39], %52 {strides = array<i32>} : memref<1x1x4x1xf32, #tpu.memory_space<vmem>>, vector<1x1x4x1xf32>,
    return
  }
  func.func @transform_0(%arg0: i32, %arg1: i32, %arg2: i32) -> (i32, i32, i32) {
    %c1_i32 = arith.constant 1 : i32
    %0 = arith.muli %arg1, %c1_i32 : i32
    %1 = arith.addi %0, %arg2 : i32
    %c0_i32 = arith.constant 0 : i32
    %c0_i32_0 = arith.constant 0 : i32
    return %arg0, %c0_i32, %1 : i32, i32, i32
  }
  func.func @transform_1(%arg0: i32, %arg1: i32, %arg2: i32) -> (i32, i32, i32) {
    %c1_i32 = arith.constant 1 : i32
    %0 = arith.muli %arg1, %c1_i32 : i32
    %1 = arith.addi %0, %arg2 : i32
    %c0_i32 = arith.constant 0 : i32
    %c0_i32_0 = arith.constant 0 : i32
    return %arg0, %c0_i32, %1 : i32, i32, i32
  }
  func.func @transform_2(%arg0: i32, %arg1: i32, %arg2: i32) -> (i32, i32, i32, i32) {
    %c0_i32 = arith.constant 0 : i32
    %c0_i32_0 = arith.constant 0 : i32
    %c0_i32_1 = arith.constant 0 : i32
    return %arg0, %arg1, %c0_i32, %c0_i32_0 : i32, i32, i32, i32
  }
  func.func @transform_3(%arg0: i32, %arg1: i32, %arg2: i32) -> (i32, i32, i32, i32) {
    %c0_i32 = arith.constant 0 : i32
    %c0_i32_0 = arith.constant 0 : i32
    %c0_i32_1 = arith.constant 0 : i32
    return %arg0, %arg1, %c0_i32, %c0_i32_0 : i32, i32, i32, i32
  }
  func.func @transform_4(%arg0: i32, %arg1: i32, %arg2: i32) -> (i32, i32, i32, i32) {
    %c0_i32 = arith.constant 0 : i32
    %c0_i32_0 = arith.constant 0 : i32
    %c0_i32_1 = arith.constant 0 : i32
    return %arg0, %arg1, %c0_i32, %c0_i32_0 : i32, i32, i32, i32
  }
}

</mosaic_0001>

<bundles_post_ra>
// kernel: combined_loss.1
= control target key start
LH: loop header
LB: loop body
LE: loop exit
PB: predicated region body
PF: predicated region fallthrough
CT: control target
= control target key end

     0   :  { %s733_s15 = smov 0   ;;  %s735_s16 = smov 0   ;;  %s829_s0 = inlined_call_operand.vmem [shape: f32[2,4,256], index: 0, kind: input, shape index: {}]   ;;  %s830_s1 = inlined_call_operand.vmem [shape: s8[2,1,256], index: 1, kind: input, shape index: {}]   ;;  %s831_s2 = inlined_call_operand.vmem [shape: f32[2,1,1,1], index: 2, kind: output, shape index: {0}]   ;;  %s832_s3 = inlined_call_operand.vmem [shape: f32[2,1,4,1], index: 3, kind: output, shape index: {1}]   ;;  %s833_s4 = inlined_call_operand.vmem [shape: f32[2,1,4,1], index: 4, kind: output, shape index: {2}]  }
   0x1   :  { %s737_s17 = smov 0  }
   0x2 LB: > { %s34_s18 = sadd.s32 1, %s701_s16  ;;  %p638_p0 = scmp.ge.s32.totalorder %s705_s17, 1  ;;  %s705_s17 = sphi %s737_s17, %s15_s17   ;;  %s701_s16 = sphi %s735_s16, %s839_s16   ;;  %s697_s15 = sphi %s733_s15, %s838_s15  }
   0x3   : > { %p36_p1 = scmp.ge.s32.totalorder %s34_s18, 2  ;;  %p223_p2 = scmp.lt.s32.totalorder %s705_s17, 3 }
   0x5   : > { %s841_s18 = smov (%p36_p1, %s34_s18), 0  ;;  %p224_p3 = pnand %p638_p0, %p223_p2 }
   0x6   : > { %p280_p4 = scmp.lt.s32.totalorder (!%p224_p3), %s697_s15, 1  ;;  %v388_v0 = vlaneseq (!%p224_p3)  ;;  %vm336_vm0 = vcmask (!%p224_p3), 1043456   ;;  %v707_v21 = vmov (!%p224_p3), 0.0   ;;  %vm325_vm3 = vcmask (!%p224_p3), 0  }
   0x7   : > { %227 = sbr.rel (%p224_p3) target bundleno = 234 (0xea), region = 28  ;;  %vm327_vm4 = vcmask (!%p224_p3), 3072  }
   0x8   : > { %v389_v1 = vshrl.u32 (!%p224_p3), %v388_v0, 7 }
   0xa   : > { %v392_v2 = vsub.s32 (!%p224_p3), 0, %v389_v1  ;;  %v396_v3 = vsub.s32 (!%p224_p3), 4, %v389_v1 }
   0xe   : > { %s843_s15 = smov (!%p280_p4, %s697_s15), 1 }
   0xf   : > { %s641_s19 = sshll.u32 %s843_s15, 1  ;;  %s646_s20 = sshll.u32 %s843_s15, 3 }
  0x10   : > { %s298_s23 = scalar_lea.vmem %s830_s1, %s641_s19  ;;  %s287_s26 = scalar_lea.vmem %s829_s0, %s646_s20 }
  0x11   : > { %v331_v4 = vld [vmem:[%s298_s23] sm:$0x3]  ;;  %s783_s29 = scalar_lea.vmem %s831_s2, %s843_s15  ;;  %s642_s30 = sshll.u32 %s843_s15, 2 }
  0x12   : > { %v330_v5 = vld [vmem:[%s287_s26] sm:$0xff]  ;;  %v332_v6 = vunpack.c.0.s8 %v331_v4  ;;  %326 = vst.msk [vmem:[%s783_s29] sm:$0x1] %vm325_vm3, %v707_v21  ;;  %s320_s7 = scalar_lea.vmem %s833_s4, %s642_s30  ;;  %s313_s10 = scalar_lea.vmem %s832_s3, %s642_s30 }
  0x13   : > { %v334_v7 = vcombine.high %v330_v5, %v330_v5  ;;  %v337_v8 = vsel %vm336_vm0, %v330_v5, -inf  ;;  %329 = vst.msk [vmem:[%s320_s7] sm:$0xf] %vm327_vm4, %v707_v21  ;;  %328 = vst.msk [vmem:[%s313_s10] sm:$0xf] %vm327_vm4, %v707_v21 }
  0x14   : > { %v338_v9 = vrot.slane %v337_v8, 4  ;;  %v393_v10 = vrot.slane %v332_v6, %v392_v2  ;;  %v397_v11 = vrot.slane %v332_v6, %v396_v3 }
  0x15   : > { %v344_v12 = vsel %vm336_vm0, %v334_v7, -inf }
  0x16   : > { %v345_v13 = vrot.slane %v344_v12, 4  ;;  %v339_v14 = vmax.f32 %v337_v8, %v338_v9  ;;  %v401_v15 = vrot.slane %v393_v10, %v392_v2  ;;  %v405_v16 = vrot.slane %v397_v11, %v392_v2 }
  0x18   : > { %v340_v17 = vrot.slane %v339_v14, 2  ;;  %vm763_vm1 = vcmp.eq.s32.totalorder %v389_v1, %v401_v15  ;;  %vm767_vm2 = vcmp.eq.s32.totalorder %v389_v1, %v405_v16  ;;  %v346_v20 = vmax.f32 %v344_v12, %v345_v13 }
  0x19   : > { %v443_v22 = vsel %vm763_vm1, 1.0, %v707_v21  ;;  %v444_v23 = vsel %vm767_vm2, 1.0, %v707_v21  ;;  %v408_v38 = vsel %vm763_vm1, %v330_v5, 0.0  ;;  %v409_v39 = vsel %vm767_vm2, %v334_v7, 0.0  ;;  %v426_v19 = vld [vmem:[%s783_s29] sm:$0x1] }
  0x1a   : > { %v445_v24 = vsel %vm336_vm0, %v443_v22, 0.0  ;;  %v446_v25 = vsel %vm336_vm0, %v444_v23, 0.0  ;;  %v341_v27 = vmax.f32 %v339_v14, %v340_v17  ;;  %v347_v28 = vrot.slane %v346_v20, 2 }
  0x1b   : > { %v447_v26 = vadd.f32 %v446_v25, %v445_v24  ;;  %v410_v43 = vsel %vm336_vm0, %v408_v38, 0.0  ;;  %v417_v45 = vsel %vm336_vm0, %v409_v39, 0.0 }
  0x1c   : > { %v342_v29 = vrot.slane %v341_v27, 1  ;;  %v348_v30 = vmax.f32 %v346_v20, %v347_v28  ;;  %v411_v48 = vrot.slane %v410_v43, 4  ;;  %v418_v51 = vrot.slane %v417_v45, 4 }
  0x1d   : > { %448 = vadd.xlane.f32.xlu0 %v447_v26 }
  0x1e   : > { %v343_v31 = vmax.f32 %v341_v27, %v342_v29  ;;  %v349_v32 = vrot.slane %v348_v30, 1  ;;  %v412_v56 = vadd.f32 %v411_v48, %v410_v43  ;;  %v419_v57 = vadd.f32 %v418_v51, %v417_v45 }
  0x20   : > { %v350_v33 = vmax.f32 %v348_v30, %v349_v32  ;;  %v413_v61 = vrot.slane %v412_v56, 2  ;;  %v420_v62 = vrot.slane %v419_v57, 2  ;;  %v460_v32 = vld [vmem:[%s320_s7] sm:$0xf] }
  0x22   : > { %v353_v34 = vcombine.low %v343_v31, %v350_v33  ;;  %v414_v63 = vadd.f32 %v413_v61, %v412_v56  ;;  %v421_v0 = vadd.f32 %v420_v62, %v419_v57 }
  0x24   : > { %v355_v35 = vsub.f32 %v330_v5, %v353_v34  ;;  %v415_v1 = vrot.slane %v414_v63, 1  ;;  %v422_v2 = vrot.slane %v421_v0, 1  ;;  %v456_v34 = vld [vmem:[%s313_s10] sm:$0xf] }
  0x26   : > { %v356_v36 = vmul.f32 1.442695, %v355_v35  ;;  %v416_v7 = vadd.f32 %v415_v1, %v414_v63  ;;  %v423_v10 = vadd.f32 %v422_v2, %v421_v0 }
  0x28   : > { %673 = vpow2.f32 %v356_v36 }
  0x32   : > { %v674_v37 = vpop.eup %673 }
  0x33   : > { %v359_v40 = vcombine.high %v674_v37, %v674_v37  ;;  %v361_v41 = vsel %vm336_vm0, %v674_v37, 0.0 }
  0x34   : > { %v362_v42 = vrot.slane %v361_v41, 4 }
  0x35   : > { %v368_v44 = vsel %vm336_vm0, %v359_v40, 0.0 }
  0x36   : > { %v363_v46 = vadd.f32 %v362_v42, %v361_v41  ;;  %v369_v47 = vrot.slane %v368_v44, 4 }
  0x38   : > { %v364_v49 = vrot.slane %v363_v46, 2  ;;  %v370_v50 = vadd.f32 %v369_v47, %v368_v44 }
  0x3a   : > { %v365_v52 = vadd.f32 %v364_v49, %v363_v46  ;;  %v371_v53 = vrot.slane %v370_v50, 2 }
  0x3c   : > { %v366_v54 = vrot.slane %v365_v52, 1  ;;  %v372_v55 = vadd.f32 %v371_v53, %v370_v50 }
  0x3e   : > { %v367_v58 = vadd.f32 %v366_v54, %v365_v52  ;;  %v373_v59 = vrot.slane %v372_v55, 1 }
  0x40   : > { %v374_v60 = vadd.f32 %v373_v59, %v372_v55  ;;  %675 = vrcp.f32 %v367_v58 }
  0x41   : > { %677 = vlog2.f32 %v367_v58 }
  0x42   : > { %679 = vlog2.f32 %v374_v60 }
  0x43   : > { %681 = vrcp.f32 %v374_v60 }
  0x4a   : > { %v676_v3 = vpop.eup %675 }
  0x4b   : > { %v678_v4 = vpop.eup %677 }
  0x4c   : > { %v680_v5 = vpop.eup %679  ;;  %v378_v6 = vmul.f32 0.6931472, %v678_v4 }
  0x4d   : > { %v682_v8 = vpop.eup %681  ;;  %v380_v9 = vmul.f32 0.6931472, %v680_v5 }
  0x4e   : > { %v381_v11 = vadd.f32 %v378_v6, %v343_v31  ;;  %v385_v12 = vcombine.low %v676_v3, %v682_v8 }
  0x4f   : > { %v382_v13 = vadd.f32 %v380_v9, %v350_v33 }
  0x50   : > { %v424_v14 = vsub.f32 %v381_v11, %v416_v7  ;;  %v387_v15 = vmul.f32 %v674_v37, %v385_v12 }
  0x51   : > { %v425_v16 = vsub.f32 %v382_v13, %v423_v10 }
  0x52   : > { %v434_v17 = vcombine.high %v387_v15, %v387_v15  ;;  %v450_v20 = vsel %vm336_vm0, %v387_v15, 0.0  ;;  %v436_v22 = vsel %vm763_vm1, %v387_v15, 0.0 }
  0x53   : > { %v427_v23 = vadd.f32 %v425_v16, %v424_v14  ;;  %v438_v24 = vsel %vm336_vm0, %v436_v22, 0.0 }
  0x54   : > { %v451_v25 = vsel %vm336_vm0, %v434_v17, 0.0  ;;  %v437_v26 = vsel %vm767_vm2, %v434_v17, 0.0 }
  0x55   : > { %428 = vadd.xlane.f32.xlu1 %v427_v23  ;;  %v452_v27 = vadd.f32 %v451_v25, %v450_v20  ;;  %v439_v28 = vsel %vm336_vm0, %v437_v26, 0.0 }
  0x56   : > { %v440_v29 = vadd.f32 %v439_v28, %v438_v24 }
  0x57   : > { %453 = vadd.xlane.f32.xlu0 %v452_v27 }
  0x59   : > { %441 = vadd.xlane.f32.xlu1 %v440_v29 }
  0xaa   : > { %v449_v18 = vpop.xlane.xlu0 %448 }
  0xe2   : > { %v429_v30 = vpop.xlane.xlu1 %428 }
  0xe3   : > { %v430_v31 = vadd.f32 %v429_v30, %v426_v19 }
  0xe4   : > { %v454_v33 = vpop.xlane.xlu0 %453 }
  0xe5   : > { %432 = vst.msk [vmem:[%s783_s29] sm:$0x1] %vm325_vm3, %v430_v31  ;;  %v455_v35 = vadd.f32 %v454_v33, %v449_v18 }
  0xe6   : > { %v442_v36 = vpop.xlane.xlu1 %441 }
  0xe7   : > { %v461_v37 = vadd.f32 %v460_v32, %v455_v35  ;;  %v457_v38 = vadd.f32 %v456_v34, %v442_v36 }
  0xe9   : > { %462 = vst.msk [vmem:[%s320_s7] sm:$0xf] %vm327_vm4, %v461_v37  ;;  %459 = vst.msk [vmem:[%s313_s10] sm:$0xf] %vm327_vm4, %v457_v38 }
  0xea PF: > { %s15_s17 = sadd.s32 1, %s705_s17   ;;  %s838_s15 = smov %s701_s16 }
  0xeb   : > { %p12_p5 = scmp.ge.s32.totalorder %s15_s17, 4   ;;  %s839_s16 = smov %s841_s18 }
  0xed   :  { %14 = sbr.rel (!%p12_p5) target bundleno = 2 (0x2), region = 89 }

</bundles_post_ra>
